<compile_context>
chip_gen: v5e
topology: v5e:2x2
jax: 0.10.0
libtpu: 0.0.40
codegen_flags: <defaults>
</compile_context>

<pallas_src>
import jax
import jax.numpy as jnp
from jax.experimental import pallas as pl
from jax.experimental.pallas import tpu as pltpu


# ----------------------------------------------------------------------------
# Path 1: zero-traffic alias kernel (output buffer IS the input buffer).
# ----------------------------------------------------------------------------
def _alias_noop_kernel(x_ref, o_ref):
    # Output aliases the input buffer (input_output_aliases={0: 0}); there are
    # no bytes to move, so the body is intentionally empty.
    del x_ref, o_ref


def _unsqueeze_alias(x: jax.Array) -> jax.Array:
    y = pl.pallas_call(
        _alias_noop_kernel,
        out_shape=jax.ShapeDtypeStruct(x.shape, x.dtype),
        in_specs=[pl.BlockSpec(memory_space=pl.ANY)],
        out_specs=pl.BlockSpec(memory_space=pl.ANY),
        input_output_aliases={0: 0},
        compiler_params=pltpu.CompilerParams(has_side_effects=True),
    )(x)
    # Free metadata reshape: insert the singleton axis at position 1.
    return jnp.expand_dims(y, 1)


# ----------------------------------------------------------------------------
# Path 2: lane-dense roofline copy kernel (fallback / when a real copy is
# mandated).
# ----------------------------------------------------------------------------
def _copy_kernel(x_ref, o_ref):
    # Shape-identical (bt, ft) blocks: plain load/store, no in-kernel reshape.
    o_ref[...] = x_ref[...]


_TARGET_TILE_BYTES = 8 * 1024 * 1024  # ~8 MiB blocks; 4 bufs + 1 MiB <= 34 MiB
_LANE = 128


def _choose_tiles(B: int, F: int, itemsize: int):
    """Pick (bt, ft) block sizes for a (B, F) copy.

    Invariants:
      * bt is a multiple of the dtype sublane-packing factor, or bt == B.
      * ft is a multiple of 128, or ft == F.
      * bt * ft * itemsize <= _TARGET_TILE_BYTES.
      * >= 2 total blocks whenever the shape allows it (v7x megacore).
    """
    sub = max(8, 32 // max(itemsize, 1))  # 8 f32, 16 bf16, 32 int8/fp8
    row_bytes = F * itemsize
    rows_per_tile = _TARGET_TILE_BYTES // max(row_bytes, 1)

    if rows_per_tile >= B:
        # Whole array fits in one block.
        bt, ft = B, F
    elif rows_per_tile >= sub:
        # Tile the batch axis only, keeping rows intact (lane-dense).
        bt, ft = (rows_per_tile // sub) * sub, F
    else:
        # Rows are large: keep a minimal aligned batch tile and tile lanes.
        bt = B if B < sub else sub
        ft = (_TARGET_TILE_BYTES // (bt * itemsize)) // _LANE * _LANE
        ft = min(max(ft, _LANE), F)

    # v7x has 2 TensorCores: make sure there are >= 2 blocks when possible so
    # the "parallel" grid axes actually shard the DMA work.
    if pl.cdiv(B, bt) * pl.cdiv(F, ft) < 2:
        if B >= 2 * sub:
            bt = max(sub, (B // 2) // sub * sub)
        elif F >= 2 * _LANE:
            ft = max(_LANE, (F // 2) // _LANE * _LANE)
    return bt, ft


def _unsqueeze_copy(x: jax.Array) -> jax.Array:
    assert x.ndim >= 1, "unsqueeze(x, 1) requires at least 1 dimension"
    B = x.shape[0]
    rest = x.shape[1:]
    F = 1
    for d in rest:
        F *= d
    out_shape = (B, 1) + rest

    if B == 0 or F == 0:
        # Degenerate: nothing to copy, pure metadata.
        return jnp.expand_dims(x, 1)

    # Free metadata reshape: make the last dim large and lane-dense.
    x2d = x.reshape(B, F)
    itemsize = jnp.dtype(x.dtype).itemsize

    bt, ft = _choose_tiles(B, F, itemsize)
    grid = (pl.cdiv(B, bt), pl.cdiv(F, ft))

    # Honest VMEM budget from the final tile: 2 in-bufs + 2 out-bufs, 1 MiB
    # headroom, floored at the 16 MiB v5e scoped default. Tiles are capped at
    # 8 MiB, so this never exceeds ~33 MiB (safe on v5e/v6e/v7x).
    tile_bytes = bt * ft * itemsize
    vmem_limit = int(max(4 * tile_bytes + (1 << 20), 16 << 20))

    out2d = pl.pallas_call(
        _copy_kernel,
        out_shape=jax.ShapeDtypeStruct((B, F), x.dtype),
        grid_spec=pltpu.PrefetchScalarGridSpec(
            num_scalar_prefetch=0,
            grid=grid,
            in_specs=[pl.BlockSpec((bt, ft), lambda i, j: (i, j))],
            out_specs=pl.BlockSpec((bt, ft), lambda i, j: (i, j)),
        ),
        compiler_params=pltpu.CompilerParams(
            dimension_semantics=("parallel", "parallel"),
            vmem_limit_bytes=vmem_limit,
        ),
    )(x2d)

    return out2d.reshape(out_shape)


# ----------------------------------------------------------------------------
# Public entry point: torch.unsqueeze(x, 1)
# ----------------------------------------------------------------------------
def unsqueeze1(x: jax.Array) -> jax.Array:
    """Equivalent of torch.unsqueeze(x, 1)."""
    try:
        # Zero HBM traffic: output buffer aliases the input buffer.
        return _unsqueeze_alias(x)
    except Exception:
        # Robust fallback: lane-dense tiled copy at the HBM roofline.
        return _unsqueeze_copy(x)


if __name__ == "__main__":
    key = jax.random.PRNGKey(0)
    x = jax.random.normal(key, (2, 4, 16, 16), dtype=jnp.float32)
    ref = jnp.expand_dims(x, 1)

    # Primary path (zero-traffic alias, with copy-kernel fallback).
    y = jax.block_until_ready(unsqueeze1(x))
    assert y.shape == (2, 1, 4, 16, 16), y.shape
    assert y.dtype == x.dtype
    assert jnp.array_equal(y, ref), "alias path mismatch vs jnp.expand_dims"

    # Also exercise the tiled copy kernel explicitly.
    y2 = jax.block_until_ready(_unsqueeze_copy(x))
    assert y2.shape == (2, 1, 4, 16, 16), y2.shape
    assert y2.dtype == x.dtype
    assert jnp.array_equal(y2, ref), "copy path mismatch vs jnp.expand_dims"

    print("KERNEL_OK")
</pallas_src>

<mosaic_0001>
module attributes {stable_mosaic.version = 11 : i64} {
  func.func @_alias_noop_kernel(%arg0: memref<2x4x16x16xf32, #tpu.memory_space<any>>, %arg1: memref<2x4x16x16xf32, #tpu.memory_space<any>>) attributes {dimension_semantics = [], scalar_prefetch = 0 : i64, scratch_operands = 0 : i64, tpu.core_type = #tpu.core_type<tc>} {
    return
  }
}

module attributes {stable_mosaic.version = 11 : i64} {
  func.func @_copy_kernel(%arg0: i32, %arg1: i32, %arg2: memref<2x512xf32, #tpu.memory_space<vmem>>, %arg3: memref<2x512xf32, #tpu.memory_space<vmem>>) attributes {dimension_semantics = [#tpu.dimension_semantics<parallel>, #tpu.dimension_semantics<parallel>], iteration_bounds = array<i64: 1, 2>, scalar_prefetch = 0 : i64, scratch_operands = 0 : i64, tpu.core_type = #tpu.core_type<tc>, window_params = [{transform_indices = @transform_0, window_bounds = array<i64: 2, 512>}, {transform_indices = @transform_1, window_bounds = array<i64: 2, 512>}]} {
    %c0 = arith.constant 0 : index
    %c0_0 = arith.constant 0 : index
    %0 = vector.load %arg2[%c0, %c0_0] : memref<2x512xf32, #tpu.memory_space<vmem>>, vector<2x512xf32>
    %c0_1 = arith.constant 0 : index
    %c0_2 = arith.constant 0 : index
    %1 = vector.load %arg3[%c0_1, %c0_2] : memref<2x512xf32, #tpu.memory_space<vmem>>, vector<2x512xf32>
    tpu.vector_store %arg3[%c0_1, %c0_2], %0 {strides = array<i32>} : memref<2x512xf32, #tpu.memory_space<vmem>>, vector<2x512xf32>,
    return
  }
  func.func @transform_0(%arg0: i32, %arg1: i32) -> (i32, i32) {
    %c0_i32 = arith.constant 0 : i32
    return %arg0, %arg1 : i32, i32
  }
  func.func @transform_1(%arg0: i32, %arg1: i32) -> (i32, i32) {
    %c0_i32 = arith.constant 0 : i32
    return %arg0, %arg1 : i32, i32
  }
}

</mosaic_0001>

<bundles_post_ra>
// kernel: tpu_custom_call.1
= control target key start
LH: loop header
LB: loop body
LE: loop exit
PB: predicated region body
PF: predicated region fallthrough
CT: control target
= control target key end

     0   :  { %s16_s0 = inlined_call_operand.hbm [shape: f32[2,4,16,16], index: 0, kind: input, shape index: {}, may-alias: {0,1}]   ;;  %s17_s1 = inlined_call_operand.hbm [shape: f32[2,4,16,16], index: 1, kind: output, shape index: {}, may-alias: {0,1}]  }

// kernel: tpu_custom_call.1
= control target key start
LH: loop header
LB: loop body
LE: loop exit
PB: predicated region body
PF: predicated region fallthrough
CT: control target
= control target key end

     0   :  { %6 = vsyncpa [#allocation3], 0  ;;  %s583_s0 = inlined_call_operand.hbm [shape: f32[2,1024], index: 0, kind: input, shape index: {}]   ;;  %s584_s1 = inlined_call_operand.hbm [shape: f32[2,1024], index: 1, kind: output, shape index: {}]  }
   0x1   :  { %8 = vsyncpa [#allocation3 + $0x1], 0 }
   0x2   :  { %9 = vsyncpa [#allocation4], 0 }
   0x3   :  { %11 = vsyncpa [#allocation4 + $0x1], 0  ;;  %s463_s6 = smov 0   ;;  %s465_s7 = smov 0  }
   0x4   :  { %s467_s8 = smov 0   ;;  %s469_s9 = smov 0  }
   0x5   :  { %s471_s10 = smov 0   ;;  %s473_s11 = smov 0  }
   0x6 LB: > { %s260_s12 = sadd.s32 4294967295, %s451_s11   ;;  %s261_s13 = sadd.s32 4294967294, %s451_s11   ;;  %s451_s11 = sphi %s473_s11, %s17_s11   ;;  %s447_s10 = sphi %s471_s10, %s593_s10   ;;  %s443_s9 = sphi %s469_s9, %s592_s9   ;;  %s439_s8 = sphi %s467_s8, %s591_s8   ;;  %s435_s7 = sphi %s465_s7, %s590_s7   ;;  %s431_s6 = sphi %s463_s6, %s589_s6  }
   0x7   : > { %s26_s14 = sadd.s32 1, %s447_s10  ;;  %s38_s15 = sadd.s32 1, %s439_s8 }
   0x8   : > { %p27_p0 = scmp.ge.s32.totalorder %s26_s14, 2  ;;  %p45_p1 = scmp.ne.s32.totalorder %s439_s8, %s435_s7 }
   0x9   : > { %p46_p2 = scmp.eq.s32.totalorder %s451_s11, 0  ;;  %p51_p3 = scmp.ne.s32.totalorder %s435_s7, %s431_s6 }
   0xa   : > { %s595_s14 = smov (%p27_p0, %s26_s14), 0  ;;  %p52_p5 = scmp.eq.s32.totalorder %s260_s12, 0 }
   0xb   : > { %p504_p4 = por %p46_p2, %p45_p1  ;;  %s34_s17 = ssub.s32 %s447_s10, %s595_s14 }
   0xc   : > { %p77_p6 = scmp.eq.s32.totalorder %s260_s12, 1  ;;  %p36_p7 = scmp.eq.s32.totalorder %s34_s17, 0 }
   0xd   : > { %p510_p8 = por %p52_p5, %p51_p3  ;;  %p83_p10 = scmp.eq.s32.totalorder %s261_s13, 1 }
   0xe   : > { %p514_p9 = por %p77_p6, %p45_p1  ;;  %p263_p12 = scmp.ge.s32.totalorder %s451_s11, 2 }
   0xf   : > { %s519_s20 = scalar_select %p36_p7, %s439_s8, %s38_s15  }
  0x10   : > { %p521_p11 = por %p83_p10, %p51_p3  ;;  %p289_p13 = scmp.lt.s32.totalorder %s451_s11, 2 }
  0x11   : > { %s103_s22 = sand.u32 1, %s439_s8   ;;  %s275_s24 = sshll.u32 %s447_s10, 3 }
  0x12   : > { %s264_s23 = sshll.u32 %s103_s22, 3  ;;  %s114_s27 = scalar_lea.hbm %s583_s0, %s275_s24 }
  0x13   : > { %s107_s28 = scalar_lea.vmem [#allocation2], %s264_s23  ;;  %s116_s30 = sshll.u32 %s114_s27, 4  ;;  %s117_s30 = int_to_ptr.hbm [resolvable:$true] %s116_s30 }
  0x14   : > { %s118_s29 = sshll.u32 %s107_s28, 4  ;;  %p282_p0 = pnand %p289_p13, %p504_p4  ;;  %s119_s29 = int_to_ptr.vmem [resolvable:$true] %s118_s29 }
  0x15   : > { %p267_p1 = scmp.ge.s32.totalorder %s451_s11, 1  ;;  %p123_p2 = scmp.lt.s32.totalorder %s451_s11, 3 }
  0x16   : > { %s104_s2 = scalar_lea.sflag [#allocation3], %s103_s22 }
  0x17   : > { %284 = dma.hbm_to_vmem [thread:$0]  (!%p282_p0), %s117_s30, 128, %s119_s29, %s104_s2  }
  0x18   : > { %p124_p3 = pnand %p267_p1, %p123_p2 }
  0x19   : > { %s537_s3 = sand.u32 (!%p124_p3), 1, %s435_s7  }
  0x1a   : > { %127 = sbr.rel (%p124_p3) target bundleno = 47 (0x2f), region = 24  ;;  %s268_s4 = sshll.u32 (!%p124_p3), %s537_s3, 3 }
  0x1b   : > { %s130_s5 = scalar_lea.sflag (!%p124_p3), [#allocation3], %s537_s3  ;;  %s133_s12 = scalar_lea.vmem (!%p124_p3), [#allocation2], %s268_s4 }
  0x1f   : > { %422 = dma.done.wait (%p510_p8), %s130_s5, 128  }
  0x20   : > { %424 = vsyncadd (%p510_p8), %s130_s5, 4294967168  ;;  %s276_s13 = sshll.u32 %s443_s9, 3  ;;  %s152_s22 = scalar_lea.vmem [#allocation5], %s268_s4  ;;  %v155_v0 = vld [vmem:[%s133_s12] sm:$0xff] }
  0x21   : > { %s171_s17 = scalar_lea.hbm %s584_s1, %s276_s13  ;;  %s173_s23 = sshll.u32 %s152_s22, 4  ;;  %156 = vst [vmem:[%s152_s22] sm:$0xff] %v155_v0  ;;  %s174_s23 = int_to_ptr.vmem [resolvable:$true] %s173_s23 }
  0x22   : > { %s175_s24 = sshll.u32 %s171_s17, 4  ;;  %s158_s25 = scalar_lea.sflag [#allocation4], %s537_s3  ;;  %s176_s24 = int_to_ptr.hbm [resolvable:$true] %s175_s24 }
  0x23   : > { %s383_s26 = sshra.s32 %s176_s24, 4  ;;  %s389_s28 = scalar_lea.hbm %s584_s1, 16  ;;  %s384_s26 = int_to_ptr.hbm [resolvable:$true] %s383_s26 }
  0x24   : > { %s385_s18 = scalar_lea.hbm %s384_s26, 8  ;;  %p390_p7 = scmp.lt.s32.totalorder %s384_s26, %s584_s1 }
  0x25   : > { %p386_p4 = scmp.ne.s32.totalorder %s384_s26, %s385_s18  ;;  %p391_p8 = scmp.lt.s32.totalorder %s389_s28, %s385_s18 }
  0x27   : > { %p387_p5 = pnand %p386_p4, %p514_p9  ;;  %p392_p10 = por %p391_p8, %p390_p7 }
  0x29   : > { %p388_p6 = pneg %p387_p5 }
  0x2b   : > { %p393_p13 = pnand %p392_p10, %p388_p6 }
  0x2d   : > { %396 = shalt.err (!%p393_p13)
}
  0x2e   : > { %279 = dma.vmem_to_hbm [thread:$0]  (%p514_p9), %s174_s23, 128, %s176_s24, %s158_s25  }
  0x2f PF: > { %s187_s2 = sand.u32 1, %s431_s6   ;;  %p286_p0 = pnand %p263_p12, %p521_p11 }
  0x30   : > { %s188_s3 = scalar_lea.sflag [#allocation4], %s187_s2 }
  0x31   : > { %p287_p1 = pneg %p286_p0 }
  0x33   : > { %426 = dma.done.wait (%p287_p1), %s188_s3, 128  }
  0x34   : > { %428 = vsyncadd (%p287_p1), %s188_s3, 4294967168  ;;  %s17_s11 = sadd.s32 1, %s451_s11   ;;  %s589_s6 = smov %s435_s7 }
  0x35   : > { %p14_p2 = scmp.ge.s32.totalorder %s17_s11, 4   ;;  %s590_s7 = smov %s439_s8 }
  0x36   : > { %s591_s8 = smov %s519_s20  ;;  %s592_s9 = smov %s447_s10 }
  0x37   : > { %s593_s10 = smov %s595_s14  ;;  %16 = sbr.rel (!%p14_p2) target bundleno = 6 (0x6), region = 69 }
  0x3c   :  { %194 = vsyncpa [#allocation3], 1 }
  0x3d   :  { %196 = vsyncpa [#allocation3 + $0x1], 1 }
  0x3e   :  { %197 = vsyncpa [#allocation4], 1 }
  0x3f   :  { %199 = vsyncpa [#allocation4 + $0x1], 1 }

</bundles_post_ra>
